<compile_context>
chip_gen: v6e
topology: v6e:2x2x1
jax: 0.10.0
libtpu: 0.0.40
codegen_flags: <defaults>
</compile_context>

<pallas_src>
import jax
import jax.numpy as jnp
from jax import lax
from jax.experimental import pallas as pl
from jax.experimental.pallas import tpu as pltpu


# ----------------------------- parameter prep ------------------------------

def _fold_bn(gamma, beta, running_mean, running_var, eps=1e-5):
    """Eval-mode BatchNorm -> per-channel (scale, bias)."""
    scale = gamma / jnp.sqrt(running_var + eps)
    bias = beta - running_mean * scale
    return scale, bias


def _band_weights(w, scale, W):
    """Fold BN scale into the conv weights and build one banded matrix per
    vertical tap dy: B_dy[wi*Cin+ci, wo*Cout+co] = (w*scale)[dy, wi-wo+1, ci, co]
    (zero outside the 3-tap band -> implements zero padding along W).

    w: (3, 3, Cin, Cout) HWIO, scale: (Cout,). Returns (3, W*Cin, W*Cout) bf16."""
    Cin, Cout = w.shape[2], w.shape[3]
    wf = w * scale[None, None, None, :]            # constant folding on params
    wi = jnp.arange(W)[:, None]
    wo = jnp.arange(W)[None, :]
    dx = wi - wo + 1                               # width tap index
    valid = (dx >= 0) & (dx <= 2)
    dx_c = jnp.clip(dx, 0, 2)
    mats = []
    for dy in range(3):
        b4 = wf[dy][dx_c]                          # (W, W, Cin, Cout)
        b4 = jnp.where(valid[:, :, None, None], b4, 0.0)
        mats.append(b4.transpose(0, 2, 1, 3).reshape(W * Cin, W * Cout))
    return jnp.stack(mats).astype(jnp.bfloat16)


# --------------------------------- kernel ----------------------------------

def _make_fused_kernel(H, WC):
    """Fused conv3x3+BN+ReLU -> conv3x3+BN -> +identity, one image per step.
    Activations live in (H, W*C) row layout: lane axis = W*C (lane-dense)."""

    def kernel(x_ref, w1_ref, b1_ref, w2_ref, b2_ref, o_ref, xpad, ypad):
        zrow = jnp.zeros((1, WC), jnp.float32)
        x = x_ref[0]                                    # (H, WC) f32

        # ---- layer1: conv3x3 (BN scale folded into weights) + bias + ReLU ----
        xpad[0:1, :] = zrow                             # zero halo rows in VMEM
        xpad[H + 1:H + 2, :] = zrow                     # (no HBM padding copy)
        xpad[1:H + 1, :] = x
        acc = jnp.zeros((H, WC), jnp.float32)
        for dy in range(3):                             # 3 fat MXU matmuls, K = WC
            a = xpad[dy:dy + H, :].astype(jnp.bfloat16)
            acc = acc + jnp.dot(a, w1_ref[dy],
                                preferred_element_type=jnp.float32)
        y = jnp.maximum(acc + b1_ref[...], 0.0)         # folded-BN bias + ReLU (f32)

        # ---- layer2: conv3x3 + bias; intermediate kept entirely in VMEM ----
        ypad[0:1, :] = zrow
        ypad[H + 1:H + 2, :] = zrow
        ypad[1:H + 1, :] = y
        acc2 = jnp.zeros((H, WC), jnp.float32)
        for dy in range(3):
            a = ypad[dy:dy + H, :].astype(jnp.bfloat16)
            acc2 = acc2 + jnp.dot(a, w2_ref[dy],
                                  preferred_element_type=jnp.float32)

        # identity shortcut + final Identity activation; lane-dense unmasked store
        o_ref[0] = (acc2 + b2_ref[...] + x).astype(o_ref.dtype)

    return kernel


# -------------------------------- wrappers ---------------------------------

def simple_resnet_block(x, params):
    """Forward of SimpleResnetBlock (identity shortcut, eval-mode BN,
    activation=None). x: (N, H, W, C) NHWC f32, Cin == Cout."""
    N, H, W, C = x.shape
    WC = W * C

    w1b = _band_weights(params["w1"], params["s1"], W)          # (3, WC, WC) bf16
    w2b = _band_weights(params["w2"], params["s2"], W)
    bias1 = jnp.tile(params["b1"], W).reshape(1, WC).astype(jnp.float32)
    bias2 = jnp.tile(params["b2"], W).reshape(1, WC).astype(jnp.float32)

    x2d = x.reshape(N, H, WC).astype(jnp.float32)               # free view: pack (W,C) on lanes

    flops = N * 2 * 3 * 2 * H * WC * WC                         # 2 layers x 3 taps
    bytes_accessed = (2 * N * H * WC * 4                        # x in + out
                      + w1b.size * 2 + w2b.size * 2 + 2 * WC * 4)

    out = pl.pallas_call(
        _make_fused_kernel(H, WC),
        out_shape=jax.ShapeDtypeStruct((N, H, WC), jnp.float32),
        grid_spec=pltpu.PrefetchScalarGridSpec(
            num_scalar_prefetch=0,
            grid=(N,),
            in_specs=[
                pl.BlockSpec((1, H, WC), lambda n: (n, 0, 0)),      # image
                pl.BlockSpec((3, WC, WC), lambda n: (0, 0, 0)),     # layer1 banded weights
                pl.BlockSpec((1, WC), lambda n: (0, 0)),            # layer1 bias
                pl.BlockSpec((3, WC, WC), lambda n: (0, 0, 0)),     # layer2 banded weights
                pl.BlockSpec((1, WC), lambda n: (0, 0)),            # layer2 bias
            ],
            out_specs=pl.BlockSpec((1, H, WC), lambda n: (n, 0, 0)),
            scratch_shapes=[pltpu.VMEM((H + 2, WC), jnp.float32),   # padded x
                            pltpu.VMEM((H + 2, WC), jnp.float32)],  # padded intermediate
        ),
        compiler_params=pltpu.CompilerParams(
            dimension_semantics=("parallel",)),
        cost_estimate=pl.CostEstimate(flops=flops, transcendentals=0,
                                      bytes_accessed=bytes_accessed),
    )(x2d, w1b, bias1, w2b, bias2)
    return out.reshape(N, H, W, C)


def simple_resnet_block_nchw(x_nchw, params):
    """NCHW entry point matching the PyTorch module's layout."""
    x = jnp.transpose(x_nchw, (0, 2, 3, 1))
    out = simple_resnet_block(x, params)
    return jnp.transpose(out, (0, 3, 1, 2))


# ------------------------------- references --------------------------------

def _reference_matched(x, params):
    """Precision-matched reference (bf16 MXU operands, f32 accumulation)."""
    dn = ("NHWC", "HWIO", "NHWC")
    w1f = (params["w1"] * params["s1"]).astype(jnp.bfloat16)
    w2f = (params["w2"] * params["s2"]).astype(jnp.bfloat16)
    y = lax.conv_general_dilated(x.astype(jnp.bfloat16), w1f, (1, 1), "SAME",
                                 dimension_numbers=dn,
                                 preferred_element_type=jnp.float32)
    y = jnp.maximum(y + params["b1"], 0.0)
    z = lax.conv_general_dilated(y.astype(jnp.bfloat16), w2f, (1, 1), "SAME",
                                 dimension_numbers=dn,
                                 preferred_element_type=jnp.float32)
    return z + params["b2"] + x


def _reference_f32(x, w1, g1, be1, m1, v1, w2, g2, be2, m2, v2, eps=1e-5):
    """Fully independent f32 reference with explicit (unfolded) eval-mode BN."""
    dn = ("NHWC", "HWIO", "NHWC")
    y = lax.conv_general_dilated(x, w1, (1, 1), "SAME", dimension_numbers=dn)
    y = g1 * (y - m1) / jnp.sqrt(v1 + eps) + be1
    y = jnp.maximum(y, 0.0)
    z = lax.conv_general_dilated(y, w2, (1, 1), "SAME", dimension_numbers=dn)
    z = g2 * (z - m2) / jnp.sqrt(v2 + eps) + be2
    return z + x


# ----------------------------------- main -----------------------------------

if __name__ == "__main__":
    # NCHW like the PyTorch module; Cin == Cout (identity shortcut); W*C = 128.
    N, C, H, W = 2, 8, 16, 16

    key = jax.random.PRNGKey(0)
    ks = jax.random.split(key, 12)
    x_nchw = jax.random.normal(ks[0], (N, C, H, W), jnp.float32)
    w1 = 0.1 * jax.random.normal(ks[1], (3, 3, C, C), jnp.float32)   # HWIO
    w2 = 0.1 * jax.random.normal(ks[2], (3, 3, C, C), jnp.float32)

    # BatchNorm params, eval mode with NONTRIVIAL running stats.
    g1 = 1.0 + 0.1 * jax.random.normal(ks[3], (C,), jnp.float32)
    be1 = 0.1 * jax.random.normal(ks[4], (C,), jnp.float32)
    m1 = 0.1 * jax.random.normal(ks[5], (C,), jnp.float32)
    v1 = 0.5 + jax.random.uniform(ks[6], (C,), jnp.float32)
    g2 = 1.0 + 0.1 * jax.random.normal(ks[7], (C,), jnp.float32)
    be2 = 0.1 * jax.random.normal(ks[8], (C,), jnp.float32)
    m2 = 0.1 * jax.random.normal(ks[9], (C,), jnp.float32)
    v2 = 0.5 + jax.random.uniform(ks[10], (C,), jnp.float32)

    s1, b1 = _fold_bn(g1, be1, m1, v1)
    s2, b2 = _fold_bn(g2, be2, m2, v2)
    params = {"w1": w1, "s1": s1, "b1": b1, "w2": w2, "s2": s2, "b2": b2}

    out_nchw = jax.block_until_ready(simple_resnet_block_nchw(x_nchw, params))
    assert out_nchw.shape == (N, C, H, W)

    # Compare in NHWC (single, correct transpose -- this was the previous bug).
    x_nhwc = jnp.transpose(x_nchw, (0, 2, 3, 1))
    out_nhwc = jnp.transpose(out_nchw, (0, 2, 3, 1))

    ref_m = jax.block_until_ready(_reference_matched(x_nhwc, params))
    ref_f = jax.block_until_ready(
        _reference_f32(x_nhwc, w1, g1, be1, m1, v1, w2, g2, be2, m2, v2))

    assert out_nhwc.shape == ref_m.shape == ref_f.shape
    assert jnp.allclose(out_nhwc, ref_m, atol=1e-2, rtol=1e-2), \
        "mismatch vs matched-precision reference"
    assert jnp.allclose(out_nhwc, ref_f, atol=5e-2, rtol=5e-2), \
        "mismatch vs f32 unfused-BN reference"
    print("KERNEL_OK")
</pallas_src>

<mosaic_0001>
module attributes {stable_mosaic.version = 11 : i64} {
  func.func @kernel(%arg0: i32, %arg1: memref<1x16x128xf32, #tpu.memory_space<vmem>>, %arg2: memref<3x128x128xbf16, #tpu.memory_space<vmem>>, %arg3: memref<1x128xf32, #tpu.memory_space<vmem>>, %arg4: memref<3x128x128xbf16, #tpu.memory_space<vmem>>, %arg5: memref<1x128xf32, #tpu.memory_space<vmem>>, %arg6: memref<1x16x128xf32, #tpu.memory_space<vmem>>, %arg7: memref<18x128xf32, #tpu.memory_space<vmem>>, %arg8: memref<18x128xf32, #tpu.memory_space<vmem>>) attributes {dimension_semantics = [#tpu.dimension_semantics<parallel>], iteration_bounds = array<i64: 2>, scalar_prefetch = 0 : i64, scratch_operands = 2 : i64, tpu.core_type = #tpu.core_type<tc>, window_params = [{transform_indices = @transform_0, window_bounds = array<i64: 1, 16, 128>}, {pipeline_mode = #tpu.pipeline_mode<synchronous>, transform_indices = @transform_1, window_bounds = array<i64: 3, 128, 128>}, {pipeline_mode = #tpu.pipeline_mode<synchronous>, transform_indices = @transform_2, window_bounds = array<i64: 1, 128>}, {pipeline_mode = #tpu.pipeline_mode<synchronous>, transform_indices = @transform_3, window_bounds = array<i64: 3, 128, 128>}, {pipeline_mode = #tpu.pipeline_mode<synchronous>, transform_indices = @transform_4, window_bounds = array<i64: 1, 128>}, {transform_indices = @transform_5, window_bounds = array<i64: 1, 16, 128>}]} {
    %cst = arith.constant 0.000000e+00 : f32
    %0 = vector.broadcast %cst : f32 to vector<1x128xf32>
    %c0 = arith.constant 0 : index
    %c0_0 = arith.constant 0 : index
    %c0_1 = arith.constant 0 : index
    %1 = vector.load %arg1[%c0, %c0_0, %c0_1] : memref<1x16x128xf32, #tpu.memory_space<vmem>>, vector<1x16x128xf32>
    %2 = vector.shape_cast %1 : vector<1x16x128xf32> to vector<16x128xf32>
    %c0_2 = arith.constant 0 : index
    %c0_3 = arith.constant 0 : index
    %3 = vector.load %arg7[%c0_2, %c0_3] : memref<18x128xf32, #tpu.memory_space<vmem>>, vector<1x128xf32>
    tpu.vector_store %arg7[%c0_2, %c0_3], %0 {strides = array<i32>} : memref<18x128xf32, #tpu.memory_space<vmem>>, vector<1x128xf32>,
    %c17 = arith.constant 17 : index
    %c0_4 = arith.constant 0 : index
    %4 = vector.load %arg7[%c17, %c0_4] : memref<18x128xf32, #tpu.memory_space<vmem>>, vector<1x128xf32>
    tpu.vector_store %arg7[%c17, %c0_4], %0 {strides = array<i32>} : memref<18x128xf32, #tpu.memory_space<vmem>>, vector<1x128xf32>,
    %c1 = arith.constant 1 : index
    %c0_5 = arith.constant 0 : index
    %5 = vector.load %arg7[%c1, %c0_5] : memref<18x128xf32, #tpu.memory_space<vmem>>, vector<16x128xf32>
    tpu.vector_store %arg7[%c1, %c0_5], %2 {strides = array<i32>} : memref<18x128xf32, #tpu.memory_space<vmem>>, vector<16x128xf32>,
    %cst_6 = arith.constant 0.000000e+00 : f32
    %6 = vector.broadcast %cst_6 : f32 to vector<16x128xf32>
    %c0_7 = arith.constant 0 : index
    %c0_8 = arith.constant 0 : index
    %7 = vector.load %arg7[%c0_7, %c0_8] : memref<18x128xf32, #tpu.memory_space<vmem>>, vector<16x128xf32>
    %8 = arith.truncf %7 : vector<16x128xf32> to vector<16x128xbf16>
    %c0_9 = arith.constant 0 : index
    %c0_10 = arith.constant 0 : index
    %c0_11 = arith.constant 0 : index
    %9 = vector.load %arg2[%c0_9, %c0_10, %c0_11] : memref<3x128x128xbf16, #tpu.memory_space<vmem>>, vector<1x128x128xbf16>
    %10 = vector.shape_cast %9 : vector<1x128x128xbf16> to vector<128x128xbf16>
    %cst_12 = arith.constant dense<0.000000e+00> : vector<16x128xf32>
    %11 = tpu.matmul %8, %10, %cst_12 {dimension_numbers = #tpu.dot_dimension_numbers<[1], [0], [0], [1], [0, 0, 1, 1], [], []>} : vector<16x128xbf16>, vector<128x128xbf16>, vector<16x128xf32> -> vector<16x128xf32>
    %12 = arith.addf %6, %11 : vector<16x128xf32>
    %c1_13 = arith.constant 1 : index
    %c0_14 = arith.constant 0 : index
    %13 = vector.load %arg7[%c1_13, %c0_14] : memref<18x128xf32, #tpu.memory_space<vmem>>, vector<16x128xf32>
    %14 = arith.truncf %13 : vector<16x128xf32> to vector<16x128xbf16>
    %c1_15 = arith.constant 1 : index
    %c0_16 = arith.constant 0 : index
    %c0_17 = arith.constant 0 : index
    %15 = vector.load %arg2[%c1_15, %c0_16, %c0_17] : memref<3x128x128xbf16, #tpu.memory_space<vmem>>, vector<1x128x128xbf16>
    %16 = vector.shape_cast %15 : vector<1x128x128xbf16> to vector<128x128xbf16>
    %cst_18 = arith.constant dense<0.000000e+00> : vector<16x128xf32>
    %17 = tpu.matmul %14, %16, %cst_18 {dimension_numbers = #tpu.dot_dimension_numbers<[1], [0], [0], [1], [0, 0, 1, 1], [], []>} : vector<16x128xbf16>, vector<128x128xbf16>, vector<16x128xf32> -> vector<16x128xf32>
    %18 = arith.addf %12, %17 : vector<16x128xf32>
    %c2 = arith.constant 2 : index
    %c0_19 = arith.constant 0 : index
    %19 = vector.load %arg7[%c2, %c0_19] : memref<18x128xf32, #tpu.memory_space<vmem>>, vector<16x128xf32>
    %20 = arith.truncf %19 : vector<16x128xf32> to vector<16x128xbf16>
    %c2_20 = arith.constant 2 : index
    %c0_21 = arith.constant 0 : index
    %c0_22 = arith.constant 0 : index
    %21 = vector.load %arg2[%c2_20, %c0_21, %c0_22] : memref<3x128x128xbf16, #tpu.memory_space<vmem>>, vector<1x128x128xbf16>
    %22 = vector.shape_cast %21 : vector<1x128x128xbf16> to vector<128x128xbf16>
    %cst_23 = arith.constant dense<0.000000e+00> : vector<16x128xf32>
    %23 = tpu.matmul %20, %22, %cst_23 {dimension_numbers = #tpu.dot_dimension_numbers<[1], [0], [0], [1], [0, 0, 1, 1], [], []>} : vector<16x128xbf16>, vector<128x128xbf16>, vector<16x128xf32> -> vector<16x128xf32>
    %24 = arith.addf %18, %23 : vector<16x128xf32>
    %c0_24 = arith.constant 0 : index
    %c0_25 = arith.constant 0 : index
    %25 = vector.load %arg3[%c0_24, %c0_25] : memref<1x128xf32, #tpu.memory_space<vmem>>, vector<1x128xf32>
    %26 = vector.broadcast %25 : vector<1x128xf32> to vector<16x128xf32>
    %27 = arith.addf %24, %26 : vector<16x128xf32>
    %cst_26 = arith.constant 0.000000e+00 : f32
    %28 = vector.broadcast %cst_26 : f32 to vector<16x128xf32>
    %29 = arith.maximumf %27, %28 : vector<16x128xf32>
    %c0_27 = arith.constant 0 : index
    %c0_28 = arith.constant 0 : index
    %30 = vector.load %arg8[%c0_27, %c0_28] : memref<18x128xf32, #tpu.memory_space<vmem>>, vector<1x128xf32>
    tpu.vector_store %arg8[%c0_27, %c0_28], %0 {strides = array<i32>} : memref<18x128xf32, #tpu.memory_space<vmem>>, vector<1x128xf32>,
    %c17_29 = arith.constant 17 : index
    %c0_30 = arith.constant 0 : index
    %31 = vector.load %arg8[%c17_29, %c0_30] : memref<18x128xf32, #tpu.memory_space<vmem>>, vector<1x128xf32>
    tpu.vector_store %arg8[%c17_29, %c0_30], %0 {strides = array<i32>} : memref<18x128xf32, #tpu.memory_space<vmem>>, vector<1x128xf32>,
    %c1_31 = arith.constant 1 : index
    %c0_32 = arith.constant 0 : index
    %32 = vector.load %arg8[%c1_31, %c0_32] : memref<18x128xf32, #tpu.memory_space<vmem>>, vector<16x128xf32>
    tpu.vector_store %arg8[%c1_31, %c0_32], %29 {strides = array<i32>} : memref<18x128xf32, #tpu.memory_space<vmem>>, vector<16x128xf32>,
    %cst_33 = arith.constant 0.000000e+00 : f32
    %33 = vector.broadcast %cst_33 : f32 to vector<16x128xf32>
    %c0_34 = arith.constant 0 : index
    %c0_35 = arith.constant 0 : index
    %34 = vector.load %arg8[%c0_34, %c0_35] : memref<18x128xf32, #tpu.memory_space<vmem>>, vector<16x128xf32>
    %35 = arith.truncf %34 : vector<16x128xf32> to vector<16x128xbf16>
    %c0_36 = arith.constant 0 : index
    %c0_37 = arith.constant 0 : index
    %c0_38 = arith.constant 0 : index
    %36 = vector.load %arg4[%c0_36, %c0_37, %c0_38] : memref<3x128x128xbf16, #tpu.memory_space<vmem>>, vector<1x128x128xbf16>
    %37 = vector.shape_cast %36 : vector<1x128x128xbf16> to vector<128x128xbf16>
    %cst_39 = arith.constant dense<0.000000e+00> : vector<16x128xf32>
    %38 = tpu.matmul %35, %37, %cst_39 {dimension_numbers = #tpu.dot_dimension_numbers<[1], [0], [0], [1], [0, 0, 1, 1], [], []>} : vector<16x128xbf16>, vector<128x128xbf16>, vector<16x128xf32> -> vector<16x128xf32>
    %39 = arith.addf %33, %38 : vector<16x128xf32>
    %c1_40 = arith.constant 1 : index
    %c0_41 = arith.constant 0 : index
    %40 = vector.load %arg8[%c1_40, %c0_41] : memref<18x128xf32, #tpu.memory_space<vmem>>, vector<16x128xf32>
    %41 = arith.truncf %40 : vector<16x128xf32> to vector<16x128xbf16>
    %c1_42 = arith.constant 1 : index
    %c0_43 = arith.constant 0 : index
    %c0_44 = arith.constant 0 : index
    %42 = vector.load %arg4[%c1_42, %c0_43, %c0_44] : memref<3x128x128xbf16, #tpu.memory_space<vmem>>, vector<1x128x128xbf16>
    %43 = vector.shape_cast %42 : vector<1x128x128xbf16> to vector<128x128xbf16>
    %cst_45 = arith.constant dense<0.000000e+00> : vector<16x128xf32>
    %44 = tpu.matmul %41, %43, %cst_45 {dimension_numbers = #tpu.dot_dimension_numbers<[1], [0], [0], [1], [0, 0, 1, 1], [], []>} : vector<16x128xbf16>, vector<128x128xbf16>, vector<16x128xf32> -> vector<16x128xf32>
    %45 = arith.addf %39, %44 : vector<16x128xf32>
    %c2_46 = arith.constant 2 : index
    %c0_47 = arith.constant 0 : index
    %46 = vector.load %arg8[%c2_46, %c0_47] : memref<18x128xf32, #tpu.memory_space<vmem>>, vector<16x128xf32>
    %47 = arith.truncf %46 : vector<16x128xf32> to vector<16x128xbf16>
    %c2_48 = arith.constant 2 : index
    %c0_49 = arith.constant 0 : index
    %c0_50 = arith.constant 0 : index
    %48 = vector.load %arg4[%c2_48, %c0_49, %c0_50] : memref<3x128x128xbf16, #tpu.memory_space<vmem>>, vector<1x128x128xbf16>
    %49 = vector.shape_cast %48 : vector<1x128x128xbf16> to vector<128x128xbf16>
    %cst_51 = arith.constant dense<0.000000e+00> : vector<16x128xf32>
    %50 = tpu.matmul %47, %49, %cst_51 {dimension_numbers = #tpu.dot_dimension_numbers<[1], [0], [0], [1], [0, 0, 1, 1], [], []>} : vector<16x128xbf16>, vector<128x128xbf16>, vector<16x128xf32> -> vector<16x128xf32>
    %51 = arith.addf %45, %50 : vector<16x128xf32>
    %c0_52 = arith.constant 0 : index
    %c0_53 = arith.constant 0 : index
    %52 = vector.load %arg5[%c0_52, %c0_53] : memref<1x128xf32, #tpu.memory_space<vmem>>, vector<1x128xf32>
    %53 = vector.broadcast %52 : vector<1x128xf32> to vector<16x128xf32>
    %54 = arith.addf %51, %53 : vector<16x128xf32>
    %55 = arith.addf %54, %2 : vector<16x128xf32>
    %c0_54 = arith.constant 0 : index
    %c0_55 = arith.constant 0 : index
    %c0_56 = arith.constant 0 : index
    %56 = vector.load %arg6[%c0_54, %c0_55, %c0_56] : memref<1x16x128xf32, #tpu.memory_space<vmem>>, vector<1x16x128xf32>
    %57 = vector.shape_cast %56 : vector<1x16x128xf32> to vector<16x128xf32>
    %58 = vector.shape_cast %55 : vector<16x128xf32> to vector<1x16x128xf32>
    tpu.vector_store %arg6[%c0_54, %c0_55, %c0_56], %58 {strides = array<i32>} : memref<1x16x128xf32, #tpu.memory_space<vmem>>, vector<1x16x128xf32>,
    return
  }
  func.func @transform_0(%arg0: i32) -> (i32, i32, i32) {
    %c0_i32 = arith.constant 0 : i32
    %c0_i32_0 = arith.constant 0 : i32
    %c0_i32_1 = arith.constant 0 : i32
    return %arg0, %c0_i32, %c0_i32_0 : i32, i32, i32
  }
  func.func @transform_1(%arg0: i32) -> (i32, i32, i32) {
    %c0_i32 = arith.constant 0 : i32
    %c0_i32_0 = arith.constant 0 : i32
    %c0_i32_1 = arith.constant 0 : i32
    %c0_i32_2 = arith.constant 0 : i32
    return %c0_i32, %c0_i32_0, %c0_i32_1 : i32, i32, i32
  }
  func.func @transform_2(%arg0: i32) -> (i32, i32) {
    %c0_i32 = arith.constant 0 : i32
    %c0_i32_0 = arith.constant 0 : i32
    %c0_i32_1 = arith.constant 0 : i32
    return %c0_i32, %c0_i32_0 : i32, i32
  }
  func.func @transform_3(%arg0: i32) -> (i32, i32, i32) {
    %c0_i32 = arith.constant 0 : i32
    %c0_i32_0 = arith.constant 0 : i32
    %c0_i32_1 = arith.constant 0 : i32
    %c0_i32_2 = arith.constant 0 : i32
    return %c0_i32, %c0_i32_0, %c0_i32_1 : i32, i32, i32
  }
  func.func @transform_4(%arg0: i32) -> (i32, i32) {
    %c0_i32 = arith.constant 0 : i32
    %c0_i32_0 = arith.constant 0 : i32
    %c0_i32_1 = arith.constant 0 : i32
    return %c0_i32, %c0_i32_0 : i32, i32
  }
  func.func @transform_5(%arg0: i32) -> (i32, i32, i32) {
    %c0_i32 = arith.constant 0 : i32
    %c0_i32_0 = arith.constant 0 : i32
    %c0_i32_1 = arith.constant 0 : i32
    return %arg0, %c0_i32, %c0_i32_0 : i32, i32, i32
  }
}

</mosaic_0001>

<bundles_post_ra>
// kernel: tpu_custom_call.1
= control target key start
LH: loop header
LB: loop body
LE: loop exit
PB: predicated region body
PF: predicated region fallthrough
CT: control target
= control target key end

     0   :  { %10 = vsyncpa [#allocation5], 0  ;;  %s1904_s0 = inlined_call_operand.hbm [shape: f32[2,16,128], index: 0, kind: input, shape index: {}]   ;;  %s1905_s1 = inlined_call_operand.hbm [shape: bf16[3,128,128], index: 1, kind: input, shape index: {}]   ;;  %s1906_s2 = inlined_call_operand.vmem [shape: f32[1,128], index: 2, kind: input, shape index: {}]   ;;  %s1907_s3 = inlined_call_operand.hbm [shape: bf16[3,128,128], index: 3, kind: input, shape index: {}]   ;;  %s1908_s4 = inlined_call_operand.vmem [shape: f32[1,128], index: 4, kind: input, shape index: {}]   ;;  %s1909_s5 = inlined_call_operand.hbm [shape: f32[2,16,128], index: 5, kind: output, shape index: {}]  }
   0x1   :  { %12 = vsyncpa [#allocation5 + $0x1], 0 }
   0x2   :  { %13 = vsyncpa [#allocation8], 0 }
   0x3   :  { %14 = vsyncpa [#allocation6], 0 }
   0x4   :  { %16 = vsyncpa [#allocation6 + $0x1], 0  ;;  %s1628_s18 = smov 0   ;;  %s1630_s19 = smov 0  }
   0x5   :  { %s1632_s20 = smov 0   ;;  %s1634_s21 = smov 0  }
   0x6 LB: > { %s1649_s22 = sadd.s32 4294967295, %s1584_s21   ;;  %s1069_s23 = sadd.s32 4294967294, %s1584_s21   ;;  %s1584_s21 = sphi %s1634_s21, %s1931_s21   ;;  %s1580_s20 = sphi %s1632_s20, %s1930_s20   ;;  %s1576_s19 = sphi %s1630_s19, %s1929_s19   ;;  %s1572_s18 = sphi %s1628_s18, %s1928_s18  }
   0x7   : > { %p42_p0 = scmp.ne.s32.totalorder %s1576_s19, %s1572_s18  ;;  %p1910_p1 = scmp.eq.s32.totalorder %s1649_s22, 0 }
   0x8   : > { %p156_p3 = scmp.eq.s32.totalorder %s1069_s23, 1  ;;  %p1070_p5 = scmp.ge.s32.totalorder %s1584_s21, 1 }
   0x9   : > { %p1658_p4 = por %p1910_p1, %p42_p0  ;;  %p163_p7 = scmp.lt.s32.totalorder %s1584_s21, 3 }
   0xa   : > { %p1663_p6 = por %p156_p3, %p42_p0  ;;  %s1586_s27 = smov [#allocation7]  }
   0xb   : > { %s1914_s24 = scalar_select %p1658_p4, 1, 0 }
   0xc   : > { %s1915_s25 = scalar_select %p1663_p6, 1, 0 }
   0xd   : > { %p1668_p8 = pnand %p1070_p5, %p163_p7  ;;  %s175_s28 = sshll.u32 %s1586_s27, 4  ;;  %s176_s28 = int_to_ptr.vmem [resolvable:$true] %s175_s28 }
   0xe   : > { %s1587_s30 = smov [#allocation9]   ;;  %s1447_s7 = scalar_lea.vmem %s176_s28, 3072 }
   0xf   : > { %s1916_s26 = scalar_select %p1668_p8, 1, 0 }
  0x10   : > { %p1325_p9 = pneg %p1668_p8  ;;  %s191_s6 = sshll.u32 %s1587_s30, 4  ;;  %s192_s6 = int_to_ptr.vmem [resolvable:$true] %s191_s6 }
  0x11   : > { %p1448_p13 = scmp.ne.s32.totalorder %s176_s28, %s1447_s7  ;;  %p1455_p5 = scmp.lt.s32.totalorder %s176_s28, %s176_s28 }
  0x12   : > { %p1677_p11 = pnand %p1325_p9, %p1910_p1  ;;  %p1456_p7 = scmp.lt.s32.totalorder %s1447_s7, %s1447_s7 }
  0x14   : > { %p1438_p12 = pneg %p1677_p11  ;;  %p1457_p10 = por %p1456_p7, %p1455_p5 }
  0x16   : > { %p1450_p0 = pnand %p1448_p13, %p1438_p12 }
  0x18   : > { %p1451_p3 = pneg %p1450_p0 }
  0x1a   : > { %p1458_p9 = pnand %p1457_p10, %p1451_p3 }
  0x1c   : > { %1461 = shalt.err (!%p1458_p9)
}
  0x1d   : > { %s1588_s8 = smov 64   ;;  %s1589_s9 = smov 4  }
  0x1e   : > { %1328 = dma.hbm_to_vmem [thread:$0]  (!%p1677_p11), %s1905_s1, 3072, %s176_s28, [#allocation8], %s1588_s8, %s1588_s8, %s1589_s9  }
  0x1f   : > { %s1473_s12 = scalar_lea.vmem %s192_s6, 3072  ;;  %p1481_p2 = scmp.lt.s32.totalorder %s192_s6, %s192_s6 }
  0x20   : > { %p1474_p1 = scmp.ne.s32.totalorder %s192_s6, %s1473_s12  ;;  %p1482_p6 = scmp.lt.s32.totalorder %s1473_s12, %s1473_s12 }
  0x22   : > { %p1476_p13 = pnand %p1474_p1, %p1438_p12  ;;  %p1483_p5 = por %p1482_p6, %p1481_p2 }
  0x24   : > { %p1477_p0 = pneg %p1476_p13 }
  0x26   : > { %p1484_p10 = pnand %p1483_p5, %p1477_p0 }
  0x28   : > { %1487 = shalt.err (!%p1484_p10)
}
  0x29   : > { %1331 = dma.hbm_to_vmem [thread:$0]  (!%p1677_p11), %s1907_s3, 3072, %s192_s6, [#allocation8], %s1588_s8, %s1588_s8, %s1589_s9  }
  0x2a   : > { %s1700_s15 = sadd.s32 1, %s1584_s21   ;;  %s29_s16 = sadd.s32 1, %s1580_s20 }
  0x2b   : > { %s26_s17 = ssub.s32 %s1584_s21, %s1700_s15  ;;  %p36_p1 = scmp.ne.s32.totalorder %s1580_s20, %s1576_s19 }
  0x2c   : > { %p27_p2 = scmp.eq.s32.totalorder %s26_s17, 0  ;;  %p37_p6 = scmp.eq.s32.totalorder %s1584_s21, 0 }
  0x2d   : > { %p1918_p12 = scmp.eq.s32.totalorder %s1649_s22, 1  ;;  %p1342_p7 = scmp.lt.s32.totalorder %s1584_s21, 2 }
  0x2e   : > { %s1716_s27 = scalar_select %p27_p2, %s1580_s20, %s29_s16  }
  0x2f   : > { %p1710_p3 = por %p1918_p12, %p36_p1  ;;  %p38_p9 = por %p37_p6, %p36_p1 }
  0x30   : > { %s208_s28 = sand.u32 1, %s1580_s20   ;;  %s1137_s30 = sshll.u32 %s1584_s21, 8 }
  0x31   : > { %s1919_s23 = scalar_select %p1710_p3, 1, 0 }
  0x32   : > { %s1074_s29 = sshll.u32 %s208_s28, 4  ;;  %s1723_s8 = scalar_lea.hbm %s1904_s0, %s1137_s30 }
  0x33   : > { %s212_s9 = scalar_lea.vmem [#allocation4], %s1074_s29  ;;  %p1727_p11 = pnand %p1342_p7, %p38_p9 }
  0x34   : > { %s219_s10 = sshll.u32 %s212_s9, 4  ;;  %s1731_s12 = scalar_lea.sflag [#allocation5], %s208_s28  ;;  %s1725_s10 = int_to_ptr.vmem [resolvable:$true] %s219_s10 }
  0x35   : > { %s1488_s13 = scalar_lea.hbm %s1723_s8, 256  ;;  %p1490_p0 = pneg %p1727_p11 }
  0x36   : > { %p1489_p13 = scmp.ne.s32.totalorder %s1723_s8, %s1488_s13  ;;  %s1493_s17 = scalar_lea.hbm %s1904_s0, 512 }
  0x37   : > { %p1494_p1 = scmp.lt.s32.totalorder %s1723_s8, %s1904_s0  ;;  %p1495_p2 = scmp.lt.s32.totalorder %s1493_s17, %s1488_s13 }
  0x38   : > { %p1491_p5 = pnand %p1490_p0, %p1489_p13 }
  0x39   : > { %p1496_p6 = por %p1495_p2, %p1494_p1 }
  0x3a   : > { %p1492_p10 = pneg %p1491_p5 }
  0x3c   : > { %p1497_p12 = pnand %p1496_p6, %p1492_p10 }
  0x3e   : > { %1500 = shalt.err (!%p1497_p12)
}
  0x3f   : > { %s1501_s28 = scalar_lea.vmem %s1725_s10, 256  ;;  %s1590_s6 = smov [#allocation4]  }
  0x40   : > { %p1502_p7 = scmp.ne.s32.totalorder %s1725_s10, %s1501_s28  ;;  %s1506_s7 = sshll.u32 %s1590_s6, 4  ;;  %s1507_s7 = int_to_ptr.vmem [resolvable:$false] %s1506_s7 }
  0x41   : > { %s1508_s9 = scalar_lea.vmem %s1507_s7, 512  ;;  %p1509_p5 = scmp.lt.s32.totalorder %s1725_s10, %s1507_s7 }
  0x42   : > { %p1504_p9 = pnand %p1502_p7, %p1490_p0  ;;  %p1510_p3 = scmp.lt.s32.totalorder %s1508_s9, %s1501_s28 }
  0x44   : > { %p1505_p13 = pneg %p1504_p9  ;;  %p1511_p4 = por %p1510_p3, %p1509_p5 }
  0x46   : > { %p1512_p8 = pnand %p1511_p4, %p1505_p13 }
  0x48   : > { %1515 = shalt.err (!%p1512_p8)
}
  0x49   : > { %s1591_s13 = smov 128   ;;  %s1592_s14 = smov 8  }
  0x4a   : > { %1335 = dma.hbm_to_vmem [thread:$0]  (!%p1727_p11), %s1723_s8, 256, %s1725_s10, %s1731_s12, %s1591_s13, %s1591_s13, %s1592_s14  }
  0x4b   : > { %p1921_p0 = scmp.ne.s32.totalorder %s1916_s26, 0 }
  0x4c   : > { %s1755_s16 = sand.u32 (!%p1921_p0), 1, %s1576_s19   ;;  %p1922_p4 = scmp.ne.s32.totalorder (!%p1921_p0), %s1914_s24, 0 }
  0x4d   : > { %231 = sbr.rel (%p1921_p0) target bundleno = 606 (0x25e), region = 40  ;;  %s1078_s17 = sshll.u32 (!%p1921_p0), %s1755_s16, 4 }
  0x4e   : > { %s234_s29 = scalar_lea.sflag (!%p1921_p0), [#allocation5], %s1755_s16  ;;  %s1761_s30 = scalar_lea.vmem (!%p1921_p0), [#allocation4], %s1078_s17 }
  0x52   : > { %1559 = dma.done.wait (%p1922_p4), %s234_s29, 256  }
  0x53   : > { %1561 = vsyncadd (%p1922_p4), %s234_s29, 4294967040  ;;  %p1923_p8 = scmp.eq.s32.totalorder %s1649_s22, 0 }
  0x55   : > { %1563 = dma.done.wait (%p1923_p8), [#allocation8], 6144   ;;  %p1924_p3 = pmov %p1923_p8 }
  0x56   : > { %v1593_v0 = vmov 0.0   ;;  %vm1594_vm0 = vmmov 0   ;;  %v1388_v1 = vld [vmem:[#allocation7 + $0x78] sm:$0xff]   ;;  %v1390_v3 = vld [vmem:[#allocation7 + $0x70] sm:$0xff]   ;;  %v1392_v5 = vld [vmem:[#allocation7 + $0x68] sm:$0xff]   ;;  %s271_s11 = scalar_lea.vmem [#allocation10], %s1078_s17 }
  0x57   : > { %1565 = vsyncadd (%p1924_p3), [#allocation8], 4294961152  ;;  %1193 = vmatprep.subr.bf16.mxu0 %v1593_v0  ;;  %275 = vst [vmem:[#allocation2] sm:$0x1] %v1593_v0  ;;  %1213 = vmatprep.subr.bf16.mxu1 %v1593_v0  ;;  %v1389_v2 = vld [vmem:[#allocation7 + $0x38] sm:$0xff]   ;;  %v1391_v4 = vld [vmem:[#allocation7 + $0x30] sm:$0xff]  }
  0x58   : > { %276 = vst [vmem:[#allocation2 + $0x11] sm:$0x1] %v1593_v0  ;;  %618 = vst [vmem:[#allocation3] sm:$0x1] %v1593_v0  ;;  %1209 = vmatprep.mubr.msk.bf16.mxu0 %vm1594_vm0, %v1593_v0  ;;  %1229 = vmatprep.mubr.msk.bf16.mxu1 %vm1594_vm0, %v1593_v0  ;;  %v1393_v6 = vld [vmem:[#allocation7 + $0x28] sm:$0xff]   ;;  %v1394_v7 = vld [vmem:[#allocation7 + $0x60] sm:$0xff]  }
  0x59   : > { %619 = vst [vmem:[#allocation3 + $0x11] sm:$0x1] %v1593_v0  ;;  %1194 = vmatpush3.bf16.msra.mxu0 %v1388_v1  ;;  %1214 = vmatpush3.bf16.msra.mxu1 %v1389_v2  ;;  %v1395_v8 = vld [vmem:[#allocation7 + $0x20] sm:$0xff]   ;;  %v1396_v9 = vld [vmem:[#allocation7 + $0x58] sm:$0xff]   ;;  %v1398_v13 = vld [vmem:[#allocation7 + $0x50] sm:$0xff]   ;;  %s977_s12 = sshll.u32 %s271_s11, 4  ;;  %s1855_s12 = int_to_ptr.vmem [resolvable:$true] %s977_s12 }
  0x5a   : > { %1195 = vmatprep.subr.bf16.mxu0 %v1593_v0  ;;  %1215 = vmatprep.subr.bf16.mxu1 %v1593_v0  ;;  %v1397_v10 = vld [vmem:[#allocation7 + $0x18] sm:$0xff]   ;;  %v1790_v11 = vld [vmem:[%s1761_s30] sm:$0xff]  ;;  %v1400_v15 = vld [vmem:[#allocation7 + $0x48] sm:$0xff]   ;;  %s1138_s28 = sshll.u32 %s1649_s22, 8  ;;  %s964_s13 = scalar_lea.sflag [#allocation6], %s1755_s16 }
  0x5b   : > { %v1793_v12 = vld [vmem:[%s1761_s30 + $0x8] sm:$0xff]  ;;  %277 = vst [vmem:[#allocation2 + $0x1] sm:$0xff] %v1790_v11  ;;  %v1399_v14 = vld [vmem:[#allocation7 + $0x10] sm:$0xff]   ;;  %v1402_v17 = vld [vmem:[#allocation7 + $0x40] sm:$0xff]   ;;  %s1860_s9 = scalar_lea.hbm %s1909_s5, %s1138_s28  ;;  %s1516_s14 = scalar_lea.vmem %s1855_s12, 256 }
  0x5c   : > { %278 = vst [vmem:[#allocation2 + $0x9] sm:$0xff] %v1793_v12  ;;  %v1401_v16 = vld [vmem:[#allocation7 + $0x8] sm:$0xff]   ;;  %v1403_v18 = vld [vmem:[#allocation7] sm:$0xff]   ;;  %v1404_v21 = vld [vmem:[#allocation7 + $0xb8] sm:$0xff]   ;;  %v300_v22 = vpack.c.bf16 %v1793_v12, %v1790_v11  ;;  %p1517_p11 = scmp.ne.s32.totalorder %s1855_s12, %s1516_s14  ;;  %p1925_p10 = scmp.ne.s32.totalorder %s1919_s23, 0 }
  0x5d   : > { %1196 = vmatpush3.bf16.msra.mxu0 %v1390_v3  ;;  %1216 = vmatpush3.bf16.msra.mxu1 %v1391_v4  ;;  %v1405_v24 = vld [vmem:[#allocation7 + $0xb0] sm:$0xff]   ;;  %v1406_v25 = vld [vmem:[#allocation7 + $0xa8] sm:$0xff]   ;;  %v1407_v26 = vld [vmem:[#allocation7 + $0xa0] sm:$0xff]   ;;  %s1595_s22 = smov [#allocation10]  }
  0x5e   : > { %1197 = vmatprep.subr.bf16.mxu0 %v1593_v0  ;;  %1217 = vmatprep.subr.bf16.mxu1 %v1593_v0  ;;  %v1408_v27 = vld [vmem:[#allocation7 + $0x98] sm:$0xff]   ;;  %v1409_v28 = vld [vmem:[#allocation7 + $0x90] sm:$0xff]   ;;  %v1410_v29 = vld [vmem:[#allocation7 + $0x88] sm:$0xff]   ;;  %p1518_p1 = pnand %p1517_p11, %p1925_p10  ;;  %s1520_s17 = sshll.u32 %s1595_s22, 4  ;;  %s1521_s17 = int_to_ptr.vmem [resolvable:$false] %s1520_s17 }
  0x5f   : > { %v1411_v30 = vld [vmem:[#allocation7 + $0x80] sm:$0xff]   ;;  %v1412_v34 = vld [vmem:[#allocation9 + $0x78] sm:$0xff]   ;;  %v1414_v36 = vld [vmem:[#allocation9 + $0x70] sm:$0xff]   ;;  %s1522_s29 = scalar_lea.vmem %s1521_s17, 512  ;;  %p1523_p6 = scmp.lt.s32.totalorder %s1855_s12, %s1521_s17 }
  0x60   : > { %v1413_v35 = vld [vmem:[#allocation9 + $0x38] sm:$0xff]   ;;  %v1415_v37 = vld [vmem:[#allocation9 + $0x30] sm:$0xff]   ;;  %v1416_v38 = vld [vmem:[#allocation9 + $0x68] sm:$0xff]   ;;  %p1519_p2 = pneg %p1518_p1  ;;  %p1524_p12 = scmp.lt.s32.totalorder %s1522_s29, %s1516_s14 }
  0x61   : > { %1198 = vmatpush3.bf16.msra.mxu0 %v1392_v5  ;;  %1218 = vmatpush3.bf16.msra.mxu1 %v1393_v6  ;;  %v1417_v39 = vld [vmem:[#allocation9 + $0x28] sm:$0xff]   ;;  %v1418_v40 = vld [vmem:[#allocation9 + $0x60] sm:$0xff]   ;;  %v1420_v41 = vld [vmem:[#allocation9 + $0x58] sm:$0xff]  }
  0x62   : > { %1199 = vmatprep.subr.bf16.mxu0 %v1593_v0  ;;  %1219 = vmatprep.subr.bf16.mxu1 %v1593_v0  ;;  %v279_v19 = vld [vmem:[#allocation2] sm:$0xff]  ;;  %v1419_v43 = vld [vmem:[#allocation9 + $0x20] sm:$0xff]   ;;  %v1424_v44 = vld [vmem:[#allocation9 + $0x48] sm:$0xff]   ;;  %p1525_p7 = por %p1524_p12, %p1523_p6 }
  0x63   : > { %v280_v20 = vld [vmem:[#allocation2 + $0x8] sm:$0xff]  ;;  %v1422_v42 = vld [vmem:[#allocation9 + $0x50] sm:$0xff]   ;;  %v1426_v46 = vld [vmem:[#allocation9 + $0x40] sm:$0xff]  }
  0x64   : > { %v281_v23 = vpack.c.bf16 %v280_v20, %v279_v19  ;;  %v496_v31 = vld [vmem:[#allocation2 + $0x2] sm:$0xff]  ;;  %v497_v32 = vld [vmem:[#allocation2 + $0xa] sm:$0xff]  ;;  %v1425_v48 = vld [vmem:[#allocation9 + $0x8] sm:$0xff]   ;;  %p1526_p9 = pnand %p1525_p7, %p1519_p2 }
  0x65   : > { %1200 = vmatpush3.bf16.msra.mxu0 %v1394_v7  ;;  %1220 = vmatpush3.bf16.msra.mxu1 %v1395_v8  ;;  %v498_v33 = vpack.c.bf16 %v497_v32, %v496_v31  ;;  %v1421_v45 = vld [vmem:[#allocation9 + $0x18] sm:$0xff]   ;;  %v1423_v47 = vld [vmem:[#allocation9 + $0x10] sm:$0xff]   ;;  %v1427_v49 = vld [vmem:[#allocation9] sm:$0xff]  }
  0x66   : > { %1201 = vmatprep.subr.bf16.mxu0 %v1593_v0  ;;  %1221 = vmatprep.subr.bf16.mxu1 %v1593_v0  ;;  %v1106_v60 = vld [vmem:[%s1906_s2] ss:$0 sm:$0xff]  ;;  %v1428_v8 = vld [vmem:[#allocation9 + $0xb8] sm:$0xff]   ;;  %v1434_v20 = vld [vmem:[#allocation9 + $0x88] sm:$0xff]  }
  0x67   : > { %v1433_v19 = vld [vmem:[#allocation9 + $0x90] sm:$0xff]  }
  0x69   : > { %1202 = vmatpush3.bf16.msra.mxu0 %v1396_v9  ;;  %1222 = vmatpush3.bf16.msra.mxu1 %v1397_v10  ;;  %v1429_v10 = vld [vmem:[#allocation9 + $0xb0] sm:$0xff]  }
  0x6a   : > { %1203 = vmatprep.subr.bf16.mxu0 %v1593_v0  ;;  %1223 = vmatprep.subr.bf16.mxu1 %v1593_v0 }
  0x6d   : > { %1204 = vmatpush3.bf16.msra.mxu0 %v1398_v13  ;;  %1224 = vmatpush3.bf16.msra.mxu1 %v1399_v14 }
  0x6e   : > { %1205 = vmatprep.subr.bf16.mxu0 %v1593_v0  ;;  %1225 = vmatprep.subr.bf16.mxu1 %v1593_v0 }
  0x71   : > { %1206 = vmatpush3.bf16.msra.mxu0 %v1400_v15  ;;  %1226 = vmatpush3.bf16.msra.mxu1 %v1401_v16  ;;  %v1430_v15 = vld [vmem:[#allocation9 + $0xa8] sm:$0xff]  }
  0x72   : > { %1207 = vmatprep.subr.bf16.mxu0 %v1593_v0  ;;  %1227 = vmatprep.subr.bf16.mxu1 %v1593_v0 }
  0x75   : > { %1208 = vmatpush3.bf16.msra.mxu0 %v1402_v17  ;;  %1228 = vmatpush3.bf16.msra.mxu1 %v1403_v18  ;;  %v1431_v17 = vld [vmem:[#allocation9 + $0xa0] sm:$0xff]   ;;  %v1432_v18 = vld [vmem:[#allocation9 + $0x98] sm:$0xff]  }
  0x76   : > { %1233 = vmatprep.subr.bf16.mxu0 %v1593_v0  ;;  %1253 = vmatprep.subr.bf16.mxu1 %v1593_v0 }
  0x78   : > { %1210 = vmatmul.mubr.bf16.vlgmr.msra.gmra.mxu0 %v300_v22  ;;  %1230 = vmatmul.mubr.bf16.vlgmr.msra.gmra.mxu1 %v281_v23 }
  0x79   : > { %1234 = vmatpush3.bf16.msra.mxu0 %v1404_v21  ;;  %1249 = vmatprep.mubr.msk.bf16.mxu0 %vm1594_vm0, %v1593_v0  ;;  %v1435_v21 = vld [vmem:[#allocation9 + $0x80] sm:$0xff]  }
  0x7a   : > { %1235 = vmatprep.subr.bf16.mxu0 %v1593_v0  ;;  %1269 = vmatprep.mubr.msk.bf16.mxu1 %vm1594_vm0, %v1593_v0 }
  0x7b   : > { %1254 = vmatpush3.bf16.msra.mxu1 %v1412_v34 }
  0x7c   : > { %1255 = vmatprep.subr.bf16.mxu1 %v1593_v0 }
  0x7d   : > { %1236 = vmatpush3.bf16.msra.mxu0 %v1405_v24 }
  0x7e   : > { %1237 = vmatprep.subr.bf16.mxu0 %v1593_v0 }
  0x7f   : > { %1256 = vmatpush3.bf16.msra.mxu1 %v1414_v36 }
  0x80   : > { %1257 = vmatprep.subr.bf16.mxu1 %v1593_v0 }
  0x81   : > { %1238 = vmatpush3.bf16.msra.mxu0 %v1406_v25 }
  0x82   : > { %1239 = vmatprep.subr.bf16.mxu0 %v1593_v0 }
  0x83   : > { %1258 = vmatpush3.bf16.msra.mxu1 %v1416_v38 }
  0x84   : > { %1259 = vmatprep.subr.bf16.mxu1 %v1593_v0 }
  0x85   : > { %1240 = vmatpush3.bf16.msra.mxu0 %v1407_v26 }
  0x86   : > { %1241 = vmatprep.subr.bf16.mxu0 %v1593_v0 }
  0x87   : > { %1260 = vmatpush3.bf16.msra.mxu1 %v1418_v40 }
  0x88   : > { %1261 = vmatprep.subr.bf16.mxu1 %v1593_v0 }
  0x89   : > { %1242 = vmatpush3.bf16.msra.mxu0 %v1408_v27 }
  0x8a   : > { %1243 = vmatprep.subr.bf16.mxu0 %v1593_v0 }
  0x8b   : > { %1262 = vmatpush3.bf16.msra.mxu1 %v1420_v41 }
  0x8c   : > { %1263 = vmatprep.subr.bf16.mxu1 %v1593_v0 }
  0x8d   : > { %1244 = vmatpush3.bf16.msra.mxu0 %v1409_v28 }
  0x8e   : > { %1245 = vmatprep.subr.bf16.mxu0 %v1593_v0 }
  0x8f   : > { %1264 = vmatpush3.bf16.msra.mxu1 %v1422_v42 }
  0x90   : > { %1265 = vmatprep.subr.bf16.mxu1 %v1593_v0 }
  0x91   : > { %1246 = vmatpush3.bf16.msra.mxu0 %v1410_v29 }
  0x92   : > { %1247 = vmatprep.subr.bf16.mxu0 %v1593_v0 }
  0x93   : > { %1266 = vmatpush3.bf16.msra.mxu1 %v1424_v44 }
  0x94   : > { %1267 = vmatprep.subr.bf16.mxu1 %v1593_v0 }
  0x95   : > { %1248 = vmatpush3.bf16.msra.mxu0 %v1411_v30 }
  0x96   : > { %1273 = vmatprep.subr.bf16.mxu0 %v1593_v0 }
  0x97   : > { %1268 = vmatpush3.bf16.msra.mxu1 %v1426_v46 }
  0x98   : > { %1250 = vmatmul.mubr.bf16.vlgmr.msra.gmra.mxu0 %v498_v33  ;;  %1293 = vmatprep.subr.bf16.mxu1 %v1593_v0 }
  0x99   : > { %1289 = vmatprep.mubr.msk.bf16.mxu0 %vm1594_vm0, %v1593_v0  ;;  %1274 = vmatpush3.bf16.msra.mxu0 %v1413_v35 }
  0x9a   : > { %1275 = vmatprep.subr.bf16.mxu0 %v1593_v0 }
  0x9d   : > { %1276 = vmatpush3.bf16.msra.mxu0 %v1415_v37 }
  0x9e   : > { %1277 = vmatprep.subr.bf16.mxu0 %v1593_v0 }
  0xa1   : > { %1278 = vmatpush3.bf16.msra.mxu0 %v1417_v39 }
  0xa2   : > { %1279 = vmatprep.subr.bf16.mxu0 %v1593_v0 }
  0xa5   : > { %1280 = vmatpush3.bf16.msra.mxu0 %v1419_v43 }
  0xa6   : > { %1281 = vmatprep.subr.bf16.mxu0 %v1593_v0 }
  0xa9   : > { %1282 = vmatpush3.bf16.msra.mxu0 %v1421_v45 }
  0xaa   : > { %1283 = vmatprep.subr.bf16.mxu0 %v1593_v0 }
  0xad   : > { %1284 = vmatpush3.bf16.msra.mxu0 %v1423_v47 }
  0xae   : > { %1285 = vmatprep.subr.bf16.mxu0 %v1593_v0 }
  0xb1   : > { %1286 = vmatpush3.bf16.msra.mxu0 %v1425_v48 }
  0xb2   : > { %1287 = vmatprep.subr.bf16.mxu0 %v1593_v0 }
  0xb5   : > { %1288 = vmatpush3.bf16.msra.mxu0 %v1427_v49 }
 0x138   : > { %v400_v50 = vpop.f32.mrf.mxu0  ;;  %v489_v51 = vpop.f32.mrf.mxu1 }
 0x139   : > { %v490_v58 = vadd.f32 %v489_v51, %v400_v50 }
 0x13a   : > { %v1211_v52 = vpop.f32.mrf.mxu0  ;;  %v1231_v53 = vpop.f32.mrf.mxu1 }
 0x13c   : > { %v403_v54 = vpop.f32.mrf.mxu0  ;;  %v492_v55 = vpop.f32.mrf.mxu1 }
 0x13d   : > { %v493_v63 = vadd.f32 %v492_v55, %v403_v54 }
 0x13e   : > { %v1212_v56 = vpop.f32.mrf.mxu0  ;;  %v1232_v57 = vpop.f32.mrf.mxu1 }
 0x158   : > { %v598_v59 = vpop.f32.mrf.mxu0 }
 0x159   : > { %v605_v61 = vadd.f32 %v598_v59, %v490_v58 }
 0x15a   : > { %v1251_v62 = vpop.f32.mrf.mxu0 }
 0x15b   : > { %v614_v1 = vadd.f32 %v1106_v60, %v605_v61 }
 0x15c   : > { %v601_v2 = vpop.f32.mrf.mxu0 }
 0x15d   : > { %v616_v3 = vmax.f32 %v614_v1, 0.0  ;;  %v606_v4 = vadd.f32 %v601_v2, %v493_v63 }
 0x15e   : > { %v1252_v5 = vpop.f32.mrf.mxu0 }
 0x15f   : > { %620 = vst [vmem:[#allocation3 + $0x1] sm:$0xff] %v616_v3  ;;  %v615_v6 = vadd.f32 %v1106_v60, %v606_v4 }
 0x161   : > { %v617_v7 = vmax.f32 %v615_v6, 0.0 }
 0x163   : > { %621 = vst [vmem:[#allocation3 + $0x9] sm:$0xff] %v617_v7  ;;  %v643_v9 = vpack.c.bf16 %v617_v7, %v616_v3 }
 0x165   : > { %1270 = vmatmul.mubr.bf16.vlgmr.msra.gmra.mxu1 %v643_v9 }
 0x166   : > { %1294 = vmatpush3.bf16.msra.mxu1 %v1428_v8  ;;  %1309 = vmatprep.mubr.msk.bf16.mxu1 %vm1594_vm0, %v1593_v0  ;;  %v622_v13 = vld [vmem:[#allocation3] sm:$0xff] }
 0x167   : > { %1295 = vmatprep.subr.bf16.mxu1 %v1593_v0 }
 0x16a   : > { %v623_v14 = vld [vmem:[#allocation3 + $0x8] sm:$0xff]  ;;  %1296 = vmatpush3.bf16.msra.mxu1 %v1429_v10 }
 0x16b   : > { %v624_v16 = vpack.c.bf16 %v623_v14, %v622_v13  ;;  %1297 = vmatprep.subr.bf16.mxu1 %v1593_v0  ;;  %v839_v22 = vld [vmem:[#allocation3 + $0x2] sm:$0xff]  ;;  %v840_v23 = vld [vmem:[#allocation3 + $0xa] sm:$0xff] }
 0x16c   : > { %v841_v24 = vpack.c.bf16 %v840_v23, %v839_v22 }
 0x16d   : > { %1290 = vmatmul.mubr.bf16.vlgmr.msra.gmra.mxu0 %v624_v16 }
 0x16e   : > { %1298 = vmatpush3.bf16.msra.mxu1 %v1430_v15 }
 0x16f   : > { %1299 = vmatprep.subr.bf16.mxu1 %v1593_v0 }
 0x172   : > { %1300 = vmatpush3.bf16.msra.mxu1 %v1431_v17 }
 0x173   : > { %1301 = vmatprep.subr.bf16.mxu1 %v1593_v0 }
 0x176   : > { %1302 = vmatpush3.bf16.msra.mxu1 %v1432_v18 }
 0x177   : > { %1303 = vmatprep.subr.bf16.mxu1 %v1593_v0 }
 0x17a   : > { %1304 = vmatpush3.bf16.msra.mxu1 %v1433_v19 }
 0x17b   : > { %1305 = vmatprep.subr.bf16.mxu1 %v1593_v0 }
 0x17e   : > { %1306 = vmatpush3.bf16.msra.mxu1 %v1434_v20 }
 0x17f   : > { %1307 = vmatprep.subr.bf16.mxu1 %v1593_v0  ;;  %v1131_v0 = vld [vmem:[%s1908_s4] ss:$0 sm:$0xff] }
 0x182   : > { %1308 = vmatpush3.bf16.msra.mxu1 %v1435_v21 }
 0x185   : > { %1310 = vmatmul.mubr.bf16.vlgmr.msra.gmra.mxu1 %v841_v24 }
 0x225   : > { %v743_v25 = vpop.f32.mrf.mxu1 }
 0x227   : > { %v1271_v26 = vpop.f32.mrf.mxu1 }
 0x229   : > { %v746_v27 = vpop.f32.mrf.mxu1 }
 0x22b   : > { %v1272_v28 = vpop.f32.mrf.mxu1 }
 0x22d   : > { %v832_v29 = vpop.f32.mrf.mxu0 }
 0x22e   : > { %v833_v33 = vadd.f32 %v832_v29, %v743_v25 }
 0x22f   : > { %v1291_v30 = vpop.f32.mrf.mxu0 }
 0x231   : > { %v835_v31 = vpop.f32.mrf.mxu0 }
 0x232   : > { %v836_v37 = vadd.f32 %v835_v31, %v746_v27 }
 0x233   : > { %v1292_v32 = vpop.f32.mrf.mxu0 }
 0x245   : > { %v941_v34 = vpop.f32.mrf.mxu1 }
 0x246   : > { %v948_v35 = vadd.f32 %v941_v34, %v833_v33 }
 0x247   : > { %v1311_v36 = vpop.f32.mrf.mxu1 }
 0x248   : > { %v957_v38 = vadd.f32 %v1131_v0, %v948_v35 }
 0x249   : > { %v944_v39 = vpop.f32.mrf.mxu1 }
 0x24a   : > { %v959_v40 = vadd.f32 %v957_v38, %v1790_v11  ;;  %v949_v41 = vadd.f32 %v944_v39, %v836_v37 }
 0x24b   : > { %v1312_v42 = vpop.f32.mrf.mxu1 }
 0x24c   : > { %961 = vst [vmem:[%s271_s11] sm:$0xff] %v959_v40  ;;  %v958_v43 = vadd.f32 %v1131_v0, %v949_v41 }
 0x24e   : > { %v960_v44 = vadd.f32 %v958_v43, %v1793_v12 }
 0x250   : > { %962 = vst [vmem:[%s271_s11 + $0x8] sm:$0xff] %v960_v44 }
 0x251   : > { %1529 = shalt.err (!%p1526_p9)
}
 0x252   : > { %s1530_s30 = scalar_lea.hbm %s1860_s9, 256  ;;  %s1534_s8 = scalar_lea.hbm %s1909_s5, 512 }
 0x253   : > { %p1531_p13 = scmp.ne.s32.totalorder %s1860_s9, %s1530_s30  ;;  %p1535_p4 = scmp.lt.s32.totalorder %s1860_s9, %s1909_s5 }
 0x254   : > { %p1536_p8 = scmp.lt.s32.totalorder %s1534_s8, %s1530_s30 }
 0x255   : > { %p1532_p5 = pnand %p1531_p13, %p1925_p10 }
 0x256   : > { %p1537_p3 = por %p1536_p8, %p1535_p4 }
 0x257   : > { %p1533_p0 = pneg %p1532_p5 }
 0x259   : > { %p1538_p11 = pnand %p1537_p3, %p1533_p0 }
 0x25b   : > { %1541 = shalt.err (!%p1538_p11)
}
 0x25c   : > { %s1596_s28 = smov 128   ;;  %s1597_s6 = smov 8  }
 0x25d   : > { %1323 = dma.vmem_to_hbm [thread:$0]  (%p1925_p10), %s1855_s12, 256, %s1860_s9, %s964_s13, %s1596_s28, %s1596_s28, %s1597_s6  }
 0x25e PF: > { %s992_s7 = sand.u32 1, %s1572_s18   ;;  %p1926_p1 = scmp.ne.s32.totalorder %s1915_s25, 0 }
 0x25f   : > { %p1927_p2 = scmp.ge.s32.totalorder %s1584_s21, 2  ;;  %s993_s14 = scalar_lea.sflag [#allocation6], %s992_s7 }
 0x261   : > { %p1337_p6 = pnand %p1927_p2, %p1926_p1 }
 0x263   : > { %p1338_p12 = pneg %p1337_p6 }
 0x265   : > { %1567 = dma.done.wait (%p1338_p12), %s993_s14, 256  }
 0x266   : > { %1569 = vsyncadd (%p1338_p12), %s993_s14, 4294967040  ;;  %p19_p7 = scmp.ge.s32.totalorder %s1700_s15, 4   ;;  %s1928_s18 = smov %s1576_s19 }
 0x267   : > { %s1929_s19 = smov %s1580_s20  ;;  %s1930_s20 = smov %s1716_s27 }
 0x268   : > { %s1931_s21 = smov %s1700_s15  ;;  %21 = sbr.rel (!%p19_p7) target bundleno = 6 (0x6), region = 97 }
 0x26d   :  { %998 = vsyncpa [#allocation5], 1 }
 0x26e   :  { %1000 = vsyncpa [#allocation5 + $0x1], 1 }
 0x26f   :  { %1001 = vsyncpa [#allocation8], 1 }
 0x270   :  { %1002 = vsyncpa [#allocation6], 1 }
 0x271   :  { %1004 = vsyncpa [#allocation6 + $0x1], 1 }

</bundles_post_ra>
